<compile_context>
chip_gen: v7x
topology: tpu7x:2x2x1
jax: 0.10.0
libtpu: 0.0.40
codegen_flags: <defaults>
</compile_context>

<pallas_src>
import jax
import jax.numpy as jnp
from jax.experimental import pallas as pl
from jax.experimental.pallas import tpu as pltpu


def _mlp_kernel(x_ref, w1_ref, b1_ref, w2_ref, b2_ref, w3_ref, b3_ref, o_ref):
    # bf16 operands for the MXU, f32 accumulation / activations.
    x = x_ref[...].astype(jnp.bfloat16)

    # Layer 1: Linear + Softsign
    h = jnp.dot(x, w1_ref[...], preferred_element_type=jnp.float32) + b1_ref[...]
    h = h * pl.reciprocal(1.0 + jnp.abs(h), approx=True)   # Softsign on EUP

    # Layer 2: Linear + Softsign
    h = jnp.dot(h.astype(jnp.bfloat16), w2_ref[...],
                preferred_element_type=jnp.float32) + b2_ref[...]
    h = h * pl.reciprocal(1.0 + jnp.abs(h), approx=True)

    # Layer 3: Linear + Sigmoid
    h = jnp.dot(h.astype(jnp.bfloat16), w3_ref[...],
                preferred_element_type=jnp.float32) + b3_ref[...]
    # sigmoid(h) == 0.5 * tanh(0.5 * h) + 0.5  -> single EUP op + FMA
    o_ref[...] = (0.5 * jnp.tanh(0.5 * h) + 0.5).astype(o_ref.dtype)


def _round_up8(n):
    return ((n + 7) // 8) * 8


def isogen_forward(x, params, *, batch_tile=4096, out_dtype=jnp.float32):
    """x: (B, vectorlen) f32 -> (B, isolen) in out_dtype (default f32).

    batch_tile: max rows per grid step (rounded up to a multiple of 8). The
    effective tile is additionally capped at round_up(ceil(B/2), 8) so the grid
    has >= 2 steps, letting the "parallel" batch axis shard across v7x's two
    TensorCores. Ragged B is handled by Pallas partial edge blocks: out-of-range
    rows of the last tile are garbage on read and masked on write, so no
    pad/slice HBM round-trips are needed.
    """
    w1, b1, w2, b2, w3, b3 = params
    B, vlen = x.shape
    isolen = w3.shape[1]

    # Pre-cast weights to bf16 once (halves weight DMA; f32 accum in-kernel).
    # (~66 KB total; callers may also pre-cast params once outside this fn.)
    w1b = w1.astype(jnp.bfloat16)
    w2b = w2.astype(jnp.bfloat16)
    w3b = w3.astype(jnp.bfloat16)

    # Tile selection: multiple of 8 (sublane rule), <= batch_tile, and >= 2
    # grid steps whenever the batch is big enough to split.
    batch_tile = max(8, _round_up8(int(batch_tile)))
    if B <= 8:
        tile = B                     # full-extent block (exempt from the 8-rule)
    else:
        tile = min(batch_tile, _round_up8(pl.cdiv(B, 2)))
    n_tiles = pl.cdiv(B, tile)
    grid = (n_tiles,)

    # Batch dim is tiled; feature dims are carried whole (they equal the full
    # array extents, which Pallas accepts even when < 128).
    x_spec = pl.BlockSpec((tile, vlen), lambda i: (i, 0))
    out_spec = pl.BlockSpec((tile, isolen), lambda i: (i, 0))

    def const_spec(shp):
        # Constant block index across the grid -> no re-DMA; single-buffer it.
        return pl.BlockSpec(shp, lambda i: (0, 0), pipeline_mode=pl.Buffered(1))

    out = pl.pallas_call(
        _mlp_kernel,
        out_shape=jax.ShapeDtypeStruct((B, isolen), out_dtype),
        grid_spec=pltpu.PrefetchScalarGridSpec(
            num_scalar_prefetch=0,
            grid=grid,
            in_specs=[
                x_spec,
                const_spec(w1b.shape), const_spec(b1.shape),
                const_spec(w2b.shape), const_spec(b2.shape),
                const_spec(w3b.shape), const_spec(b3.shape),
            ],
            out_specs=out_spec,
        ),
        compiler_params=pltpu.CompilerParams(
            dimension_semantics=("parallel",),
            vmem_limit_bytes=32 * 1024 * 1024),
    )(x, w1b, b1, w2b, b2, w3b, b3)

    return out


def init_params(key, isolen=128, vectorlen=20):
    """Deterministic synthetic init (PyTorch-Linear-style uniform bounds)."""
    h1 = isolen
    h2 = isolen
    ks = jax.random.split(key, 6)

    def lin(kw, kb, fan_in, fan_out):
        bound = 1.0 / jnp.sqrt(fan_in)
        w = jax.random.uniform(kw, (fan_in, fan_out), jnp.float32, -bound, bound)
        b = jax.random.uniform(kb, (1, fan_out), jnp.float32, -bound, bound)
        return w, b

    w1, b1 = lin(ks[0], ks[1], vectorlen, h1)
    w2, b2 = lin(ks[2], ks[3], h1, h2)
    w3, b3 = lin(ks[4], ks[5], h2, isolen)
    return (w1, b1, w2, b2, w3, b3)


def reference_forward(x, params):
    w1, b1, w2, b2, w3, b3 = params
    h = x @ w1 + b1
    h = h / (1.0 + jnp.abs(h))
    h = h @ w2 + b2
    h = h / (1.0 + jnp.abs(h))
    h = h @ w3 + b3
    return jax.nn.sigmoid(h)


if __name__ == "__main__":
    # Small test shapes; batch=13 exercises the ragged (partial edge-block)
    # path and gives a 2-step grid (v7x dual-TC sharding path).
    isolen, vectorlen, batch = 128, 20, 13

    key = jax.random.PRNGKey(0)
    k_params, k_x = jax.random.split(key)
    params = init_params(k_params, isolen=isolen, vectorlen=vectorlen)
    x = jax.random.normal(k_x, (batch, vectorlen), jnp.float32)

    out = isogen_forward(x, params)
    out = jax.block_until_ready(out)

    ref = reference_forward(x, params)
    assert out.shape == (batch, isolen)
    # bf16 MXU operands (f32 accumulation) + approx reciprocal in Softsign
    # -> loosened tolerance vs the f32 reference.
    assert jnp.allclose(out, ref, atol=2e-2, rtol=2e-2), "mismatch vs reference"

    print("KERNEL_OK")
</pallas_src>

<mosaic_0001>
module attributes {stable_mosaic.version = 11 : i64} {
  func.func @_mlp_kernel(%arg0: i32, %arg1: memref<8x20xf32, #tpu.memory_space<vmem>>, %arg2: memref<20x128xbf16, #tpu.memory_space<vmem>>, %arg3: memref<1x128xf32, #tpu.memory_space<vmem>>, %arg4: memref<128x128xbf16, #tpu.memory_space<vmem>>, %arg5: memref<1x128xf32, #tpu.memory_space<vmem>>, %arg6: memref<128x128xbf16, #tpu.memory_space<vmem>>, %arg7: memref<1x128xf32, #tpu.memory_space<vmem>>, %arg8: memref<8x128xf32, #tpu.memory_space<vmem>>) attributes {dimension_semantics = [#tpu.dimension_semantics<parallel>], iteration_bounds = array<i64: 2>, scalar_prefetch = 0 : i64, scratch_operands = 0 : i64, tpu.core_type = #tpu.core_type<tc>, window_params = [{transform_indices = @transform_0, window_bounds = array<i64: 8, 20>}, {pipeline_mode = #tpu.pipeline_mode<synchronous>, transform_indices = @transform_1, window_bounds = array<i64: 20, 128>}, {pipeline_mode = #tpu.pipeline_mode<synchronous>, transform_indices = @transform_2, window_bounds = array<i64: 1, 128>}, {pipeline_mode = #tpu.pipeline_mode<synchronous>, transform_indices = @transform_3, window_bounds = array<i64: 128, 128>}, {pipeline_mode = #tpu.pipeline_mode<synchronous>, transform_indices = @transform_4, window_bounds = array<i64: 1, 128>}, {pipeline_mode = #tpu.pipeline_mode<synchronous>, transform_indices = @transform_5, window_bounds = array<i64: 128, 128>}, {pipeline_mode = #tpu.pipeline_mode<synchronous>, transform_indices = @transform_6, window_bounds = array<i64: 1, 128>}, {transform_indices = @transform_7, window_bounds = array<i64: 8, 128>}]} {
    %c0 = arith.constant 0 : index
    %c0_0 = arith.constant 0 : index
    %0 = vector.load %arg1[%c0, %c0_0] : memref<8x20xf32, #tpu.memory_space<vmem>>, vector<8x20xf32>
    %1 = arith.truncf %0 : vector<8x20xf32> to vector<8x20xbf16>
    %c0_1 = arith.constant 0 : index
    %c0_2 = arith.constant 0 : index
    %2 = vector.load %arg2[%c0_1, %c0_2] : memref<20x128xbf16, #tpu.memory_space<vmem>>, vector<20x128xbf16>
    %cst = arith.constant dense<0.000000e+00> : vector<8x128xf32>
    %3 = tpu.matmul %1, %2, %cst {dimension_numbers = #tpu.dot_dimension_numbers<[1], [0], [0], [1], [0, 0, 1, 1], [], []>} : vector<8x20xbf16>, vector<20x128xbf16>, vector<8x128xf32> -> vector<8x128xf32>
    %c0_3 = arith.constant 0 : index
    %c0_4 = arith.constant 0 : index
    %4 = vector.load %arg3[%c0_3, %c0_4] : memref<1x128xf32, #tpu.memory_space<vmem>>, vector<1x128xf32>
    %5 = vector.broadcast %4 : vector<1x128xf32> to vector<8x128xf32>
    %6 = arith.addf %3, %5 : vector<8x128xf32>
    %7 = math.absf %6 : vector<8x128xf32>
    %cst_5 = arith.constant 1.000000e+00 : f32
    %8 = vector.broadcast %cst_5 : f32 to vector<8x128xf32>
    %9 = arith.addf %8, %7 : vector<8x128xf32>
    %10 = tpu.reciprocal %9 {approx = true} : vector<8x128xf32> -> vector<8x128xf32>
    %11 = arith.mulf %6, %10 : vector<8x128xf32>
    %12 = arith.truncf %11 : vector<8x128xf32> to vector<8x128xbf16>
    %c0_6 = arith.constant 0 : index
    %c0_7 = arith.constant 0 : index
    %13 = vector.load %arg4[%c0_6, %c0_7] : memref<128x128xbf16, #tpu.memory_space<vmem>>, vector<128x128xbf16>
    %cst_8 = arith.constant dense<0.000000e+00> : vector<8x128xf32>
    %14 = tpu.matmul %12, %13, %cst_8 {dimension_numbers = #tpu.dot_dimension_numbers<[1], [0], [0], [1], [0, 0, 1, 1], [], []>} : vector<8x128xbf16>, vector<128x128xbf16>, vector<8x128xf32> -> vector<8x128xf32>
    %c0_9 = arith.constant 0 : index
    %c0_10 = arith.constant 0 : index
    %15 = vector.load %arg5[%c0_9, %c0_10] : memref<1x128xf32, #tpu.memory_space<vmem>>, vector<1x128xf32>
    %16 = vector.broadcast %15 : vector<1x128xf32> to vector<8x128xf32>
    %17 = arith.addf %14, %16 : vector<8x128xf32>
    %18 = math.absf %17 : vector<8x128xf32>
    %cst_11 = arith.constant 1.000000e+00 : f32
    %19 = vector.broadcast %cst_11 : f32 to vector<8x128xf32>
    %20 = arith.addf %19, %18 : vector<8x128xf32>
    %21 = tpu.reciprocal %20 {approx = true} : vector<8x128xf32> -> vector<8x128xf32>
    %22 = arith.mulf %17, %21 : vector<8x128xf32>
    %23 = arith.truncf %22 : vector<8x128xf32> to vector<8x128xbf16>
    %c0_12 = arith.constant 0 : index
    %c0_13 = arith.constant 0 : index
    %24 = vector.load %arg6[%c0_12, %c0_13] : memref<128x128xbf16, #tpu.memory_space<vmem>>, vector<128x128xbf16>
    %cst_14 = arith.constant dense<0.000000e+00> : vector<8x128xf32>
    %25 = tpu.matmul %23, %24, %cst_14 {dimension_numbers = #tpu.dot_dimension_numbers<[1], [0], [0], [1], [0, 0, 1, 1], [], []>} : vector<8x128xbf16>, vector<128x128xbf16>, vector<8x128xf32> -> vector<8x128xf32>
    %c0_15 = arith.constant 0 : index
    %c0_16 = arith.constant 0 : index
    %26 = vector.load %arg7[%c0_15, %c0_16] : memref<1x128xf32, #tpu.memory_space<vmem>>, vector<1x128xf32>
    %27 = vector.broadcast %26 : vector<1x128xf32> to vector<8x128xf32>
    %28 = arith.addf %25, %27 : vector<8x128xf32>
    %cst_17 = arith.constant 5.000000e-01 : f32
    %29 = vector.broadcast %cst_17 : f32 to vector<8x128xf32>
    %30 = arith.mulf %29, %28 : vector<8x128xf32>
    %31 = math.tanh %30 : vector<8x128xf32>
    %cst_18 = arith.constant 5.000000e-01 : f32
    %32 = vector.broadcast %cst_18 : f32 to vector<8x128xf32>
    %33 = arith.mulf %32, %31 : vector<8x128xf32>
    %cst_19 = arith.constant 5.000000e-01 : f32
    %34 = vector.broadcast %cst_19 : f32 to vector<8x128xf32>
    %35 = arith.addf %33, %34 : vector<8x128xf32>
    %c0_20 = arith.constant 0 : index
    %c0_21 = arith.constant 0 : index
    %36 = vector.load %arg8[%c0_20, %c0_21] : memref<8x128xf32, #tpu.memory_space<vmem>>, vector<8x128xf32>
    tpu.vector_store %arg8[%c0_20, %c0_21], %35 {strides = array<i32>} : memref<8x128xf32, #tpu.memory_space<vmem>>, vector<8x128xf32>,
    return
  }
  func.func @transform_0(%arg0: i32) -> (i32, i32) {
    %c0_i32 = arith.constant 0 : i32
    %c0_i32_0 = arith.constant 0 : i32
    return %arg0, %c0_i32 : i32, i32
  }
  func.func @transform_1(%arg0: i32) -> (i32, i32) {
    %c0_i32 = arith.constant 0 : i32
    %c0_i32_0 = arith.constant 0 : i32
    %c0_i32_1 = arith.constant 0 : i32
    return %c0_i32, %c0_i32_0 : i32, i32
  }
  func.func @transform_2(%arg0: i32) -> (i32, i32) {
    %c0_i32 = arith.constant 0 : i32
    %c0_i32_0 = arith.constant 0 : i32
    %c0_i32_1 = arith.constant 0 : i32
    return %c0_i32, %c0_i32_0 : i32, i32
  }
  func.func @transform_3(%arg0: i32) -> (i32, i32) {
    %c0_i32 = arith.constant 0 : i32
    %c0_i32_0 = arith.constant 0 : i32
    %c0_i32_1 = arith.constant 0 : i32
    return %c0_i32, %c0_i32_0 : i32, i32
  }
  func.func @transform_4(%arg0: i32) -> (i32, i32) {
    %c0_i32 = arith.constant 0 : i32
    %c0_i32_0 = arith.constant 0 : i32
    %c0_i32_1 = arith.constant 0 : i32
    return %c0_i32, %c0_i32_0 : i32, i32
  }
  func.func @transform_5(%arg0: i32) -> (i32, i32) {
    %c0_i32 = arith.constant 0 : i32
    %c0_i32_0 = arith.constant 0 : i32
    %c0_i32_1 = arith.constant 0 : i32
    return %c0_i32, %c0_i32_0 : i32, i32
  }
  func.func @transform_6(%arg0: i32) -> (i32, i32) {
    %c0_i32 = arith.constant 0 : i32
    %c0_i32_0 = arith.constant 0 : i32
    %c0_i32_1 = arith.constant 0 : i32
    return %c0_i32, %c0_i32_0 : i32, i32
  }
  func.func @transform_7(%arg0: i32) -> (i32, i32) {
    %c0_i32 = arith.constant 0 : i32
    %c0_i32_0 = arith.constant 0 : i32
    return %arg0, %c0_i32 : i32, i32
  }
}

</mosaic_0001>

<bundles_post_ra>
// kernel: tpu_custom_call.1
= control target key start
LH: loop header
LB: loop body
LE: loop exit
PB: predicated region body
PF: predicated region fallthrough
CT: control target
= control target key end

     0   :  { %12 = vsyncpa [#allocation3], 0  ;;  %s1511_s0 = inlined_call_operand.hbm [shape: f32[13,20], index: 0, kind: input, shape index: {}]   ;;  %s1512_s1 = inlined_call_operand.hbm [shape: bf16[20,128], index: 1, kind: input, shape index: {}]   ;;  %s1513_s2 = inlined_call_operand.vmem [shape: f32[1,128], index: 2, kind: input, shape index: {}]   ;;  %s1514_s3 = inlined_call_operand.hbm [shape: bf16[128,128], index: 3, kind: input, shape index: {}]   ;;  %s1515_s4 = inlined_call_operand.vmem [shape: f32[1,128], index: 4, kind: input, shape index: {}]   ;;  %s1516_s5 = inlined_call_operand.hbm [shape: bf16[128,128], index: 5, kind: input, shape index: {}]   ;;  %s1517_s6 = inlined_call_operand.vmem [shape: f32[1,128], index: 6, kind: input, shape index: {}]   ;;  %s1518_s7 = inlined_call_operand.hbm [shape: f32[13,128], index: 7, kind: output, shape index: {}]  }
   0x1   :  { %14 = vsyncpa [#allocation3 + $0x1], 0 }
   0x2   :  { %15 = vsyncpa [#allocation6], 0 }
   0x3   :  { %16 = vsyncpa [#allocation9], 0 }
   0x4   :  { %17 = vsyncpa [#allocation4], 0 }
   0x5   :  { %19 = vsyncpa [#allocation4 + $0x1], 0  ;;  %s1211_s24 = smov 0   ;;  %s1213_s25 = smov 0  }
   0x6   :  { %s1215_s26 = smov 0   ;;  %s1217_s27 = smov 0  }
   0x7 LB: > { %s1232_s28 = sadd.s32 4294967295, %s1160_s27   ;;  %s758_s29 = sadd.s32 4294967294, %s1160_s27   ;;  %s1160_s27 = sphi %s1217_s27, %s1544_s27   ;;  %s1156_s26 = sphi %s1215_s26, %s1543_s26   ;;  %s1152_s25 = sphi %s1213_s25, %s1542_s25   ;;  %s1148_s24 = sphi %s1211_s24, %s1541_s24  }
   0x8   : > { %p45_p0 = scmp.ne.s32.totalorder %s1152_s25, %s1148_s24  ;;  %p1519_p1 = scmp.eq.s32.totalorder %s1232_s28, 0 }
   0x9   : > { %p201_p3 = scmp.eq.s32.totalorder %s758_s29, 1  ;;  %p759_p5 = scmp.ge.s32.totalorder %s1160_s27, 1 }
   0xa   : > { %p1241_p4 = por %p1519_p1, %p45_p0  ;;  %p208_p7 = scmp.lt.s32.totalorder %s1160_s27, 3 }
   0xb   : > { %p1246_p6 = por %p201_p3, %p45_p0  ;;  %s1162_s10 = smov [#allocation5]  }
   0xc   : > { %s1523_s30 = scalar_select %p1241_p4, 1, 0 }
   0xd   : > { %s1524_s8 = scalar_select %p1246_p6, 1, 0 }
   0xe   : > { %p1251_p8 = pnand %p759_p5, %p208_p7  ;;  %s220_s11 = sshll.u32 %s1162_s10, 4  ;;  %s1255_s11 = int_to_ptr.vmem [resolvable:$true] %s220_s11 }
   0xf   : > { %1525 = sst [smem:[#allocation15_spill]] %s1524_s8  ;;  %s1163_s13 = smov [#allocation7]  }
  0x10   : > { %s1526_s9 = scalar_select %p1251_p8, 1, 0 }
  0x11   : > { %p883_p9 = pneg %p1251_p8  ;;  %s236_s14 = sshll.u32 %s1163_s13, 4  ;;  %s1266_s14 = int_to_ptr.vmem [resolvable:$true] %s236_s14 }
  0x12   : > { %s1164_s15 = smov [#allocation8]   ;;  %s972_s19 = scalar_lea.hbm %s1512_s1, 192 }
  0x13   : > { %p1262_p11 = pnand %p883_p9, %p1519_p1  ;;  %s1268_s16 = sshll.u32 %s1164_s15, 4  ;;  %s253_s16 = int_to_ptr.vmem [resolvable:$true] %s1268_s16 }
  0x14   : > { %p973_p12 = scmp.ne.s32.totalorder %s1512_s1, %s972_s19  ;;  %p979_p5 = scmp.lt.u32.totalorder %s972_s19, %s1512_s1 }
  0x15   : > { %p1278_p13 = pneg %p1262_p11 }
  0x17   : > { %p975_p0 = pnand %p1278_p13, %p973_p12 }
  0x19   : > { %p976_p3 = pneg %p975_p0 }
  0x1b   : > { %p981_p7 = pnand %p979_p5, %p976_p3 }
  0x1d   : > { %984 = shalt.err (!%p981_p7)
}
  0x1e   : > { %s985_s10 = scalar_lea.vmem %s1255_s11, 192  ;;  %p993_p2 = scmp.lt.s32.totalorder %s1255_s11, %s1255_s11 }
  0x1f   : > { %p986_p9 = scmp.ne.s32.totalorder %s1255_s11, %s985_s10  ;;  %p994_p6 = scmp.lt.s32.totalorder %s985_s10, %s985_s10 }
  0x21   : > { %p988_p10 = pnand %p986_p9, %p1278_p13  ;;  %p995_p12 = por %p994_p6, %p993_p2 }
  0x23   : > { %p989_p1 = pneg %p988_p10 }
  0x25   : > { %p996_p0 = pnand %p995_p12, %p989_p1 }
  0x27   : > { %999 = shalt.err (!%p996_p0)
}
  0x28   : > { %s1165_s13 = smov 64   ;;  %s1166_s15 = smov 4  }
  0x29   : > { %886 = dma.hbm_to_vmem [thread:$0]  (!%p1262_p11), %s1512_s1, 192, %s1255_s11, [#allocation6], %s1165_s13, %s1165_s13, %s1166_s15  }
  0x2a   : > { %s1000_s21 = scalar_lea.hbm %s1514_s3, 1024 }
  0x2b   : > { %p1001_p1 = scmp.ne.s32.totalorder %s1514_s3, %s1000_s21  ;;  %p1007_p10 = scmp.lt.u32.totalorder %s1000_s21, %s1514_s3 }
  0x2d   : > { %p1003_p2 = pnand %p1001_p1, %p1278_p13 }
  0x2f   : > { %p1004_p6 = pneg %p1003_p2 }
  0x31   : > { %p1009_p3 = pnand %p1007_p10, %p1004_p6 }
  0x33   : > { %1012 = shalt.err (!%p1009_p3)
}
  0x34   : > { %s1013_s11 = scalar_lea.vmem %s1266_s14, 1024  ;;  %p1021_p12 = scmp.lt.s32.totalorder %s1266_s14, %s1266_s14 }
  0x35   : > { %p1014_p5 = scmp.ne.s32.totalorder %s1266_s14, %s1013_s11  ;;  %p1022_p0 = scmp.lt.s32.totalorder %s1013_s11, %s1013_s11 }
  0x37   : > { %p1016_p7 = pnand %p1014_p5, %p1278_p13  ;;  %p1023_p1 = por %p1022_p0, %p1021_p12 }
  0x39   : > { %p1017_p9 = pneg %p1016_p7 }
  0x3b   : > { %p1024_p2 = pnand %p1023_p1, %p1017_p9 }
  0x3d   : > { %1027 = shalt.err (!%p1024_p2)
}
  0x3e   : > { %889 = dma.hbm_to_vmem [thread:$0]  (!%p1262_p11), %s1514_s3, 1024, %s1266_s14, [#allocation6], %s1165_s13, %s1165_s13, %s1166_s15  }
  0x3f   : > { %s1028_s20 = scalar_lea.hbm %s1516_s5, 1024 }
  0x40   : > { %p1029_p6 = scmp.ne.s32.totalorder %s1516_s5, %s1028_s20  ;;  %p1035_p5 = scmp.lt.u32.totalorder %s1028_s20, %s1516_s5 }
  0x42   : > { %p1031_p10 = pnand %p1029_p6, %p1278_p13 }
  0x44   : > { %p1032_p3 = pneg %p1031_p10 }
  0x46   : > { %p1037_p7 = pnand %p1035_p5, %p1032_p3 }
  0x48   : > { %1040 = shalt.err (!%p1037_p7)
}
  0x49   : > { %s1041_s11 = scalar_lea.vmem %s253_s16, 1024  ;;  %p1049_p1 = scmp.lt.s32.totalorder %s253_s16, %s253_s16 }
  0x4a   : > { %p1042_p9 = scmp.ne.s32.totalorder %s253_s16, %s1041_s11  ;;  %p1050_p2 = scmp.lt.s32.totalorder %s1041_s11, %s1041_s11 }
  0x4c   : > { %p1044_p12 = pnand %p1042_p9, %p1278_p13  ;;  %p1051_p4 = por %p1050_p2, %p1049_p1 }
  0x4e   : > { %p1045_p0 = pneg %p1044_p12 }
  0x50   : > { %p1052_p8 = pnand %p1051_p4, %p1045_p0 }
  0x52   : > { %1055 = shalt.err (!%p1052_p8)
}
  0x53   : > { %892 = dma.hbm_to_vmem [thread:$0]  (!%p1262_p11), %s1516_s5, 1024, %s253_s16, [#allocation9], %s1165_s13, %s1165_s13, %s1166_s15  }
  0x54   : > { %s1351_s22 = sadd.s32 1, %s1160_s27   ;;  %s32_s17 = sadd.s32 1, %s1156_s26 }
  0x55   : > { %s29_s12 = ssub.s32 %s1160_s27, %s1351_s22  ;;  %p39_p8 = scmp.ne.s32.totalorder %s1156_s26, %s1152_s25 }
  0x56   : > { %p30_p4 = scmp.eq.s32.totalorder %s29_s12, 0  ;;  %p40_p13 = scmp.eq.s32.totalorder %s1160_s27, 0 }
  0x57   : > { %p904_p6 = scmp.lt.s32.totalorder %s1160_s27, 2  ;;  %p1529_p3 = scmp.eq.s32.totalorder %s1232_s28, 1 }
  0x58   : > { %s1361_s18 = scalar_select %p30_p4, %s1156_s26, %s32_s17  }
  0x59   : > { %p41_p10 = por %p40_p13, %p39_p8  ;;  %p1365_p5 = por %p1529_p3, %p39_p8 }
  0x5a   : > { %s269_s20 = sand.u32 1, %s1156_s26   ;;  %s765_s21 = sshll.u32 %s1160_s27, 7 }
  0x5b   : > { %s764_s16 = sshll.u32 %s269_s20, 3  ;;  %s1374_s23 = scalar_lea.hbm %s1511_s0, %s765_s21 }
  0x5c   : > { %s273_s29 = scalar_lea.vmem [#allocation2], %s764_s16  ;;  %p1376_p11 = pnand %p904_p6, %p41_p10 }
  0x5d   : > { %s280_s10 = sshll.u32 %s273_s29, 4  ;;  %s270_s14 = scalar_lea.sflag [#allocation3], %s269_s20  ;;  %s1380_s10 = int_to_ptr.vmem [resolvable:$true] %s280_s10 }
  0x5e   : > { %s1056_s8 = scalar_lea.hbm %s1374_s23, 128  ;;  %p1058_p9 = pneg %p1376_p11 }
  0x5f   : > { %p1057_p7 = scmp.ne.s32.totalorder %s1374_s23, %s1056_s8  ;;  %s1061_s21 = scalar_lea.hbm %s1511_s0, 256 }
  0x60   : > { %p1062_p1 = scmp.lt.u32.totalorder %s1374_s23, %s1511_s0  ;;  %p1063_p2 = scmp.lt.u32.totalorder %s1061_s21, %s1056_s8 }
  0x61   : > { %p1059_p12 = pnand %p1058_p9, %p1057_p7  ;;  %p1065_p8 = scmp.lt.u32.totalorder %s1056_s8, %s1374_s23 }
  0x62   : > { %p1064_p4 = por %p1063_p2, %p1062_p1 }
  0x63   : > { %p1060_p0 = pneg %p1059_p12 }
  0x64   : > { %p1066_p13 = por %p1065_p8, %p1064_p4 }
  0x66   : > { %p1067_p6 = pnand %p1066_p13, %p1060_p0 }
  0x68   : > { %1070 = shalt.err (!%p1067_p6)
}
  0x69   : > { %s1071_s20 = scalar_lea.vmem %s1380_s10, 128  ;;  %s1167_s15 = smov [#allocation2]  }
  0x6a   : > { %p1072_p10 = scmp.ne.s32.totalorder %s1380_s10, %s1071_s20  ;;  %s1076_s29 = sshll.u32 %s1167_s15, 4  ;;  %s1077_s29 = int_to_ptr.vmem [resolvable:$false] %s1076_s29 }
  0x6b   : > { %s1078_s12 = scalar_lea.vmem %s1077_s29, 256  ;;  %p1079_p12 = scmp.lt.s32.totalorder %s1380_s10, %s1077_s29 }
  0x6c   : > { %p1074_p3 = pnand %p1072_p10, %p1058_p9  ;;  %p1080_p1 = scmp.lt.s32.totalorder %s1078_s12, %s1071_s20 }
  0x6e   : > { %p1075_p7 = pneg %p1074_p3  ;;  %p1081_p2 = por %p1080_p1, %p1079_p12 }
  0x70   : > { %p1082_p4 = pnand %p1081_p2, %p1075_p7 }
  0x72   : > { %1085 = shalt.err (!%p1082_p4)
}
  0x73   : > { %896 = dma.hbm_to_vmem [thread:$0]  (!%p1376_p11), %s1374_s23, 128, %s1380_s10, %s270_s14  }
  0x74   : > { %p1532_p0 = scmp.ne.s32.totalorder %s1526_s9, 0 }
  0x75   : > { %s1410_s8 = sand.u32 (!%p1532_p0), 1, %s1152_s25   ;;  %p1533_p9 = scmp.ne.s32.totalorder (!%p1532_p0), %s1523_s30, 0 }
  0x76   : > { %289 = sbr.rel (%p1532_p0) target bundleno = 854 (0x356), region = 48  ;;  %s767_s17 = sshll.u32 (!%p1532_p0), %s1410_s8, 3 }
  0x77   : > { %s292_s21 = scalar_lea.sflag (!%p1532_p0), [#allocation3], %s1410_s8  ;;  %s295_s16 = scalar_lea.vmem (!%p1532_p0), [#allocation2], %s767_s17 }
  0x7d   : > { %1131 = dma.done.wait (%p1533_p9), %s292_s21, 128  }
  0x7e   : > { %1133 = vsyncadd (%p1533_p9), %s292_s21, 4294967168  ;;  %p1534_p11 = scmp.eq.s32.totalorder %s1232_s28, 0 }
  0x80   : > { %1135 = dma.done.wait (%p1534_p11), [#allocation6], 1216   ;;  %p1535_p8 = pmov %p1534_p11 }
  0x82   : > { %1137 = vsyncadd (%p1535_p8), [#allocation6], 4294966080  ;;  %p1536_p13 = pmov %p1535_p8 }
  0x83   : > { %p1537_p6 = pmov %p1535_p8 }
  0x84   : > { %1139 = dma.done.wait (%p1536_p13), [#allocation9], 1024  }
  0x85   : > { %1141 = vsyncadd (%p1537_p6), [#allocation9], 4294966272  ;;  %v1168_v0 = vmov 0.0   ;;  %vm1169_vm0 = vmmov 0   ;;  %v948_v1 = vld [vmem:[#allocation5] sm:$0xff]   ;;  %vm364_vm1 = vcmask 1041408  }
  0x86   : > { %819 = vmatprep.subr.bf16.mxu0 %v1168_v0  ;;  %823 = vmatprep.mubr.msk.bf16.mxu0 %vm1169_vm0, %v1168_v0  ;;  %v949_v2 = vld [vmem:[#allocation5 + $0x8] ss:$0 sps:$4 sm:$0x33]   ;;  %v339_v3 = vld [vmem:[%s295_s16] sm:$0xff]  ;;  %vm360_vm2 = vcmask 162816   ;;  %s795_s13 = sshll.u32 %s1232_s28, 7 }
  0x87   : > { %827 = vmatprep.subr.bf16.mxu1 %v1168_v0  ;;  %843 = vmatprep.mubr.msk.bf16.mxu1 %vm1169_vm0, %v1168_v0  ;;  %v950_v4 = vld [vmem:[#allocation7] sm:$0xff]   ;;  %v366_v5 = vsel %vm364_vm1, %v949_v2, 0  ;;  %v951_v6 = vld [vmem:[#allocation7 + $0x8] sm:$0xff]   ;;  %v340_v7 = vpack.c.bf16 %v339_v3, %v339_v3  ;;  %v952_v8 = vld [vmem:[#allocation7 + $0x10] sm:$0xff]   ;;  %s337_s20 = scalar_lea.vmem [#allocation10], %s767_s17  ;;  %s1467_s21 = scalar_lea.hbm %s1518_s7, %s795_s13 }
  0x88   : > { %820 = vmatpush3.bf16.msra.mxu0 %v948_v1  ;;  %828 = vmatpush3.bf16.msra.mxu1 %v950_v4  ;;  %v953_v9 = vld [vmem:[#allocation7 + $0x18] sm:$0xff]   ;;  %v954_v10 = vld [vmem:[#allocation7 + $0x20] sm:$0xff]   ;;  %v955_v11 = vld [vmem:[#allocation7 + $0x28] sm:$0xff]   ;;  %s659_s15 = sshll.u32 %s337_s20, 4  ;;  %s646_s16 = scalar_lea.sflag [#allocation4], %s1410_s8  ;;  %s1469_s15 = int_to_ptr.vmem [resolvable:$true] %s659_s15 }
  0x89   : > { %821 = vmatprep.subr.bf16.mxu0 %v1168_v0  ;;  %829 = vmatprep.subr.bf16.mxu1 %v1168_v0  ;;  %v956_v12 = vld [vmem:[#allocation7 + $0x30] sm:$0xff]   ;;  %v957_v13 = vld [vmem:[#allocation7 + $0x38] sm:$0xff]   ;;  %v958_v14 = vld [vmem:[#allocation8] sm:$0xff]   ;;  %s1086_s30 = scalar_lea.vmem %s1469_s15, 128  ;;  %s1170_s28 = smov [#allocation10]  }
  0x8a   : > { %v959_v15 = vld [vmem:[#allocation8 + $0x8] sm:$0xff]   ;;  %v960_v16 = vld [vmem:[#allocation8 + $0x10] sm:$0xff]   ;;  %v772_v17 = vld [vmem:[%s1513_s2] ss:$0 sm:$0xff]  ;;  %p1087_p10 = scmp.ne.s32.totalorder %s1469_s15, %s1086_s30  ;;  %s1090_s17 = sshll.u32 %s1170_s28, 4  ;;  %s1091_s17 = int_to_ptr.vmem [resolvable:$false] %s1090_s17 }
  0x8b   : > { %v961_v28 = vld [vmem:[#allocation8 + $0x18] sm:$0xff]   ;;  %v962_v29 = vld [vmem:[#allocation8 + $0x20] sm:$0xff]   ;;  %v963_v30 = vld [vmem:[#allocation8 + $0x28] sm:$0xff]   ;;  %s1092_s9 = scalar_lea.vmem %s1091_s17, 256  ;;  %p1093_p12 = scmp.lt.s32.totalorder %s1469_s15, %s1091_s17 }
  0x8c   : > { %822 = vmatpush3.bf16.msra.mxu0 %v366_v5  ;;  %830 = vmatpush3.bf16.msra.mxu1 %v951_v6  ;;  %v964_v31 = vld [vmem:[#allocation8 + $0x30] sm:$0xff]   ;;  %v965_v32 = vld [vmem:[#allocation8 + $0x38] sm:$0xff]   ;;  %v776_v33 = vld [vmem:[%s1515_s4] ss:$0 sm:$0xff]  ;;  %p1088_p3 = pnand %p1087_p10, %p1365_p5  ;;  %p1094_p1 = scmp.lt.s32.totalorder %s1092_s9, %s1086_s30 }
  0x8d   : > { %847 = vmatprep.subr.bf16.mxu0 %v1168_v0  ;;  %831 = vmatprep.subr.bf16.mxu1 %v1168_v0  ;;  %v785_v44 = vld [vmem:[%s1517_s6] ss:$0 sm:$0xff] }
  0x8e   : > { %p1089_p7 = pneg %p1088_p3  ;;  %p1095_p2 = por %p1094_p1, %p1093_p12 }
  0x8f   : > { %824 = vmatmul.mubr.msk.bf16.vlgmr.msra.gmra.mrb[0].mxu0 %vm360_vm2, %v340_v7 }
  0x90   : > { %863 = vmatprep.mubr.msk.bf16.mxu0 %vm1169_vm0, %v1168_v0  ;;  %832 = vmatpush3.bf16.msra.mxu1 %v952_v8  ;;  %p1096_p4 = pnand %p1095_p2, %p1089_p7 }
  0x91   : > { %833 = vmatprep.subr.bf16.mxu1 %v1168_v0  ;;  %848 = vmatpush3.bf16.msra.mxu0 %v958_v14 }
  0x92   : > { %849 = vmatprep.subr.bf16.mxu0 %v1168_v0 }
  0x94   : > { %834 = vmatpush3.bf16.msra.mxu1 %v953_v9 }
  0x95   : > { %835 = vmatprep.subr.bf16.mxu1 %v1168_v0  ;;  %850 = vmatpush3.bf16.msra.mxu0 %v959_v15 }
  0x96   : > { %851 = vmatprep.subr.bf16.mxu0 %v1168_v0 }
  0x98   : > { %836 = vmatpush3.bf16.msra.mxu1 %v954_v10 }
  0x99   : > { %837 = vmatprep.subr.bf16.mxu1 %v1168_v0  ;;  %852 = vmatpush3.bf16.msra.mxu0 %v960_v16 }
  0x9a   : > { %853 = vmatprep.subr.bf16.mxu0 %v1168_v0 }
  0x9c   : > { %838 = vmatpush3.bf16.msra.mxu1 %v955_v11 }
  0x9d   : > { %839 = vmatprep.subr.bf16.mxu1 %v1168_v0  ;;  %854 = vmatpush3.bf16.msra.mxu0 %v961_v28 }
  0x9e   : > { %855 = vmatprep.subr.bf16.mxu0 %v1168_v0 }
  0xa0   : > { %840 = vmatpush3.bf16.msra.mxu1 %v956_v12 }
  0xa1   : > { %841 = vmatprep.subr.bf16.mxu1 %v1168_v0  ;;  %856 = vmatpush3.bf16.msra.mxu0 %v962_v29 }
  0xa2   : > { %857 = vmatprep.subr.bf16.mxu0 %v1168_v0 }
  0xa4   : > { %842 = vmatpush3.bf16.msra.mxu1 %v957_v13 }
  0xa5   : > { %858 = vmatpush3.bf16.msra.mxu0 %v963_v30 }
  0xa6   : > { %859 = vmatprep.subr.bf16.mxu0 %v1168_v0 }
  0xa9   : > { %860 = vmatpush3.bf16.msra.mxu0 %v964_v31 }
  0xaa   : > { %861 = vmatprep.subr.bf16.mxu0 %v1168_v0 }
  0xad   : > { %862 = vmatpush3.bf16.msra.mxu0 %v965_v32 }
 0x162   : > { %v402_v18 = vpop.f32.mrb[0].mxu0 }
 0x163   : > { %v403_v19 = vadd.f32 %v772_v17, %v402_v18  ;;  %v825_v20 = vpop.f32.mrb[1].mxu0 }
 0x164   : > { %v405_v21 = vpop.f32.mrb[2].mxu0 }
 0x165   : > { %v408_v22 = vand.u32 2147483647, %v403_v19  ;;  %v826_v23 = vpop.f32.mrb[3].mxu0 }
 0x167   : > { %v409_v24 = vadd.f32 1.0, %v408_v22 }
 0x169   : > { %966 = vrcp.f32 %v409_v24 }
 0x173   : > { %v967_v25 = vpop.eup %966 }
 0x174   : > { %v411_v26 = vmul.f32 %v967_v25, %v403_v19 }
 0x176   : > { %v412_v27 = vpack.c.bf16 %v411_v26, %v411_v26 }
 0x178   : > { %844 = vmatmul.mubr.bf16.vlgmr.msra.gmra.mrb[0].mxu1 %v412_v27 }
 0x24b   : > { %v518_v34 = vpop.f32.mrb[0].mxu1 }
 0x24c   : > { %v519_v35 = vadd.f32 %v776_v33, %v518_v34  ;;  %v845_v36 = vpop.f32.mrb[1].mxu1 }
 0x24d   : > { %v521_v37 = vpop.f32.mrb[2].mxu1 }
 0x24e   : > { %v524_v38 = vand.u32 2147483647, %v519_v35  ;;  %v846_v39 = vpop.f32.mrb[3].mxu1 }
 0x250   : > { %v525_v40 = vadd.f32 1.0, %v524_v38 }
 0x252   : > { %968 = vrcp.f32 %v525_v40 }
 0x25c   : > { %v969_v41 = vpop.eup %968 }
 0x25d   : > { %v527_v42 = vmul.f32 %v969_v41, %v519_v35 }
 0x25f   : > { %v528_v43 = vpack.c.bf16 %v527_v42, %v527_v42 }
 0x261   : > { %864 = vmatmul.mubr.bf16.vlgmr.msra.gmra.mrb[4].mxu0 %v528_v43 }
 0x334   : > { %v634_v45 = vpop.f32.mrb[4].mxu0 }
 0x335   : > { %v635_v46 = vadd.f32 %v785_v44, %v634_v45  ;;  %v865_v47 = vpop.f32.mrb[5].mxu0 }
 0x336   : > { %v637_v48 = vpop.f32.mrb[6].mxu0 }
 0x337   : > { %v640_v49 = vmul.f32 0.5, %v635_v46  ;;  %v866_v50 = vpop.f32.mrb[7].mxu0 }
 0x339   : > { %970 = vtanh.f32 %v640_v49 }
 0x343   : > { %v971_v51 = vpop.eup %970 }
 0x344   : > { %v642_v52 = vmul.f32 0.5, %v971_v51 }
 0x346   : > { %v643_v53 = vadd.f32 0.5, %v642_v52 }
 0x348   : > { %644 = vst [vmem:[%s337_s20] sm:$0xff] %v643_v53 }
 0x349   : > { %1099 = shalt.err (!%p1096_p4)
}
 0x34a   : > { %s1100_s8 = scalar_lea.hbm %s1467_s21, 128  ;;  %s1104_s11 = scalar_lea.hbm %s1518_s7, 256 }
 0x34b   : > { %p1101_p0 = scmp.ne.s32.totalorder %s1467_s21, %s1100_s8  ;;  %p1105_p8 = scmp.lt.u32.totalorder %s1467_s21, %s1518_s7 }
 0x34c   : > { %p1106_p13 = scmp.lt.u32.totalorder %s1104_s11, %s1100_s8  ;;  %p1108_p10 = scmp.lt.u32.totalorder %s1100_s8, %s1467_s21 }
 0x34d   : > { %p1102_p9 = pnand %p1101_p0, %p1365_p5 }
 0x34e   : > { %p1107_p6 = por %p1106_p13, %p1105_p8 }
 0x34f   : > { %p1103_p11 = pneg %p1102_p9 }
 0x350   : > { %p1109_p3 = por %p1108_p10, %p1107_p6 }
 0x352   : > { %p1110_p7 = pnand %p1109_p3, %p1103_p11 }
 0x354   : > { %1113 = shalt.err (!%p1110_p7)
}
 0x355   : > { %881 = dma.vmem_to_hbm [thread:$0]  (%p1365_p5), %s1469_s15, 128, %s1467_s21, %s646_s16  }
 0x356 PF: > { %s1538_s20 = sld [smem:[#allocation15_spill]]  ;;  %s671_s29 = sand.u32 1, %s1148_s24  }
 0x357   : > { %p1540_p1 = scmp.ge.s32.totalorder %s1160_s27, 2  ;;  %s672_s12 = scalar_lea.sflag [#allocation4], %s671_s29 }
 0x35c   : > { %p1539_p12 = scmp.ne.s32.totalorder %s1538_s20, 0 }
 0x35e   : > { %p898_p2 = pnand %p1540_p1, %p1539_p12 }
 0x360   : > { %1143 = dma.done.wait (!%p898_p2), %s672_s12, 128  }
 0x361   : > { %1145 = vsyncadd (!%p898_p2), %s672_s12, 4294967168  ;;  %p22_p4 = scmp.ge.s32.totalorder %s1351_s22, 4   ;;  %s1541_s24 = smov %s1152_s25 }
 0x362   : > { %s1542_s25 = smov %s1156_s26  ;;  %s1543_s26 = smov %s1361_s18 }
 0x363   : > { %s1544_s27 = smov %s1351_s22  ;;  %24 = sbr.rel (!%p22_p4) target bundleno = 7 (0x7), region = 105 }
 0x36a   :  { %677 = vsyncpa [#allocation3], 1 }
 0x36b   :  { %679 = vsyncpa [#allocation3 + $0x1], 1 }
 0x36c   :  { %680 = vsyncpa [#allocation6], 1 }
 0x36d   :  { %681 = vsyncpa [#allocation9], 1 }
 0x36e   :  { %682 = vsyncpa [#allocation4], 1 }
 0x36f   :  { %684 = vsyncpa [#allocation4 + $0x1], 1 }

</bundles_post_ra>
